<compile_context>
chip_gen: v5e
topology: v5e:2x2
jax: 0.10.0
libtpu: 0.0.40
codegen_flags: <defaults>
</compile_context>

<pallas_src>
import jax
import jax.numpy as jnp
from jax.experimental import pallas as pl
from jax.experimental.pallas import tpu as pltpu


def _round_up(x, m):
    return (x + m - 1) // m * m


def _vmem_capacity_bytes(default=64 * 1024 * 1024):
    """Per-core VMEM capacity; conservative (v7x-sized) fallback if unavailable."""
    try:
        info = pltpu.get_tpu_info()
        cap = getattr(info, "vmem_capacity_bytes", None)
        if cap:
            return int(cap)
    except Exception:
        pass
    return default


# ---------------------------------------------------------------------------
# Kernels
# ---------------------------------------------------------------------------
def _patch_embed_kernel(p_ref, w_ref, b_ref, o_ref):
    """Single-shot projection: out = patches @ W + b (whole K resident)."""
    acc = jnp.dot(p_ref[...], w_ref[...], preferred_element_type=jnp.float32)
    o_ref[...] = (acc + b_ref[...]).astype(o_ref.dtype)


def _patch_embed_kernel_ktiled(p_ref, w_ref, b_ref, o_ref, acc_ref):
    """K-tiled projection with an f32 VMEM accumulator (K axis last, arbitrary)."""
    k = pl.program_id(1)

    @pl.when(k == 0)
    def _init():
        acc_ref[...] = jnp.zeros_like(acc_ref)

    acc_ref[...] += jnp.dot(p_ref[...], w_ref[...],
                            preferred_element_type=jnp.float32)

    @pl.when(k == pl.num_programs(1) - 1)
    def _finalize():
        o_ref[...] = (acc_ref[...] + b_ref[...]).astype(o_ref.dtype)


# ---------------------------------------------------------------------------
# Wrapper
# ---------------------------------------------------------------------------
def patch_embedding(x, weight, bias, patch_sizes, *,
                    tm_target=None, k_tile=None,
                    compute_dtype=jnp.bfloat16, out_dtype=None,
                    channels_last=False):
    """Equivalent of nn.Conv3d(C, E, kernel_size=patch_sizes, stride=patch_sizes).

    x:      (B, C, D, H, W)
    weight: (E, C, pd, ph, pw)
    bias:   (E,)
    returns (B, E, D//pd, H//ph, W//pw)   (or channels-last if channels_last=True)

    Call under jax.jit so allow_input_fusion can fold the patch-matrix producer
    (cast/reshape/transpose of x) into the pallas_call input pipeline.
    """
    B, C, D, H, W = x.shape
    pd, ph, pw = patch_sizes
    E = weight.shape[0]
    Dp, Hp, Wp = D // pd, H // ph, W // pw
    # Conv with stride == kernel floors any ragged spatial tail.
    if (Dp * pd, Hp * ph, Wp * pw) != (D, H, W):
        x = x[:, :, :Dp * pd, :Hp * ph, :Wp * pw]
    K = C * pd * ph * pw
    M = B * Dp * Hp * Wp

    out_dtype = x.dtype if out_dtype is None else out_dtype
    out_bytes = jnp.dtype(out_dtype).itemsize
    cd_bytes = jnp.dtype(compute_dtype).itemsize

    # Lane-dense output: pad embedding dim to a multiple of 128 lanes.
    E_pad = _round_up(E, 128)

    # ---- generation-aware VMEM budget -------------------------------------
    vmem_cap = _vmem_capacity_bytes()
    vmem_budget = min(max(int(vmem_cap * 0.7), 16 << 20), 100 << 20)
    if tm_target is None:
        if vmem_budget >= (80 << 20):
            tm_target = 2048
        elif vmem_budget >= (40 << 20):
            tm_target = 1024
        else:
            tm_target = 512

    # ---- K handling: optional 128-alignment + contraction tiling ----------
    K_al = K if (K % 128 == 0 or K < 128) else _round_up(K, 128)
    if k_tile is not None:
        tk = int(k_tile)
        if tk < K_al:
            if tk % 128 != 0:
                raise ValueError("k_tile must be a multiple of 128 (lane width)")
            K_al = _round_up(K, tk)
        else:
            tk = K_al
    else:
        weight_budget = vmem_budget // 3
        if K_al * E_pad * cd_bytes <= weight_budget:
            tk = K_al                                   # weight fully resident
        else:
            tk = (weight_budget // (2 * E_pad * cd_bytes)) // 128 * 128
            tk = int(max(128, min(tk, _round_up(K_al, 128))))
            K_al = _round_up(K_al, tk)
    nk = max(1, K_al // tk)

    # ---- M tile selection ---------------------------------------------------
    acc_row = E_pad * 4 if nk > 1 else 0
    per_row = 2 * tk * cd_bytes + 2 * E_pad * out_bytes + acc_row
    resident = 2 * tk * E_pad * cd_bytes + 2 * E_pad * 4
    tm_vmem = max(0, vmem_budget - resident) // per_row
    tm = int(min(tm_target, tm_vmem)) if tm_vmem > 0 else 16
    # v7x megacore: make sure the parallel M axis has >= 2 grid steps.
    if M >= 512:
        tm = min(tm, _round_up(pl.cdiv(M, 2), 256))
    if tm >= M:
        tm = M                                  # full-dim block (always legal)
    elif tm >= 256:
        tm = (tm // 256) * 256                  # MXU-pass aligned
    else:
        tm = max(16, (tm // 16) * 16)
    grid_m = pl.cdiv(M, tm)                     # ragged tail handled by masking

    # ---- glue: patch-matrix producer (fused into the call when jitted) -----
    xb = x.astype(compute_dtype)
    xp = xb.reshape(B, C, Dp, pd, Hp, ph, Wp, pw)
    xp = xp.transpose(0, 2, 4, 6, 1, 3, 5, 7)   # (B, D', H', W', C, pd, ph, pw)
    patches = xp.reshape(M, K)
    if K_al != K:
        patches = jnp.pad(patches, ((0, 0), (0, K_al - K)))

    w_mat = weight.reshape(E, K).T.astype(compute_dtype)        # (K, E)
    b_vec = bias.astype(jnp.float32)
    if K_al != K:
        w_mat = jnp.pad(w_mat, ((0, K_al - K), (0, 0)))
    if E_pad != E:
        w_mat = jnp.pad(w_mat, ((0, 0), (0, E_pad - E)))
        b_vec = jnp.pad(b_vec, (0, E_pad - E))
    b_mat = b_vec.reshape(1, E_pad)

    # ---- kernel / scratch selection ----------------------------------------
    if nk == 1:
        kernel = _patch_embed_kernel
        scratch_shapes = ()
    else:
        kernel = _patch_embed_kernel_ktiled
        scratch_shapes = (pltpu.VMEM((tm, E_pad), jnp.float32),)

    need = (2 * tm * tk * cd_bytes              # streamed patch blocks (dbl-buf)
            + 2 * tk * E_pad * cd_bytes         # weight blocks
            + 2 * E_pad * 4                     # bias
            + 2 * tm * E_pad * out_bytes        # output blocks
            + (tm * E_pad * 4 if nk > 1 else 0) # accumulator scratch
            + (2 << 20))                        # Mosaic internal headroom
    vmem_limit = int(min(max(need, 4 << 20), int(vmem_cap * 0.9)))

    cost = pl.CostEstimate(
        flops=2 * M * K_al * E_pad,
        transcendentals=0,
        bytes_accessed=(M * K * x.dtype.itemsize
                        + K_al * E_pad * cd_bytes
                        + M * E_pad * out_bytes),
    )

    out2d = pl.pallas_call(
        kernel,
        out_shape=jax.ShapeDtypeStruct((M, E_pad), out_dtype),
        grid_spec=pltpu.PrefetchScalarGridSpec(
            num_scalar_prefetch=0,
            grid=(grid_m, nk),
            in_specs=[
                pl.BlockSpec((tm, tk), lambda i, k: (i, k)),      # streamed patches
                pl.BlockSpec((tk, E_pad), lambda i, k: (k, 0)),   # weight
                pl.BlockSpec((1, E_pad), lambda i, k: (0, 0)),    # bias
            ],
            out_specs=pl.BlockSpec((tm, E_pad), lambda i, k: (i, 0)),
            scratch_shapes=scratch_shapes,
        ),
        compiler_params=pltpu.CompilerParams(
            dimension_semantics=("parallel", "arbitrary"),
            vmem_limit_bytes=vmem_limit,
            # Let XLA fuse the cast/reshape/transpose producer of `patches`
            # into the pallas_call input pipeline (kills the HBM intermediate).
            allow_input_fusion=[True, False, False],
        ),
        cost_estimate=cost,
    )(patches, w_mat, b_mat)

    out = out2d[:, :E].reshape(B, Dp, Hp, Wp, E)
    if channels_last:
        return out
    return out.transpose(0, 4, 1, 2, 3)          # (B, E, D', H', W')


# ---------------------------------------------------------------------------
# Reference + test
# ---------------------------------------------------------------------------
def _reference(x, weight, bias, patch_sizes):
    out = jax.lax.conv_general_dilated(
        x.astype(jnp.float32), weight.astype(jnp.float32),
        window_strides=patch_sizes, padding="VALID",
        dimension_numbers=("NCDHW", "OIDHW", "NCDHW"),
        precision=jax.lax.Precision.HIGHEST,
    )
    return out + bias.reshape(1, -1, 1, 1, 1).astype(jnp.float32)


if __name__ == "__main__":
    key = jax.random.PRNGKey(0)
    k1, k2, k3, k4, k5, k6 = jax.random.split(key, 6)

    B, C, D, H, W = 2, 4, 8, 8, 8

    # --- Case 1: resident-weight (single K step) path ---
    ps1 = (2, 2, 2)
    E1 = 32
    x1 = jax.random.normal(k1, (B, C, D, H, W), dtype=jnp.float32)
    w1 = jax.random.normal(k2, (E1, C) + ps1, dtype=jnp.float32) * 0.05
    b1 = jax.random.normal(k3, (E1,), dtype=jnp.float32) * 0.05
    fwd1 = jax.jit(lambda x, w, b: patch_embedding(x, w, b, ps1))
    out1 = jax.block_until_ready(fwd1(x1, w1, b1))
    ref1 = _reference(x1, w1, b1, ps1)
    assert out1.shape == ref1.shape == (B, E1, D // 2, H // 2, W // 2)
    assert jnp.allclose(out1, ref1, atol=3e-2, rtol=3e-2)

    # --- Case 2: K-tiled accumulator path (k_tile forces a 2-step contraction) ---
    ps2 = (4, 4, 4)
    E2 = 32
    x2 = jax.random.normal(k4, (B, C, D, H, W), dtype=jnp.float32)
    w2 = jax.random.normal(k5, (E2, C) + ps2, dtype=jnp.float32) * 0.05
    b2 = jax.random.normal(k6, (E2,), dtype=jnp.float32) * 0.05
    fwd2 = jax.jit(lambda x, w, b: patch_embedding(x, w, b, ps2, k_tile=128))
    out2 = jax.block_until_ready(fwd2(x2, w2, b2))
    ref2 = _reference(x2, w2, b2, ps2)
    assert out2.shape == ref2.shape == (B, E2, D // 4, H // 4, W // 4)
    assert jnp.allclose(out2, ref2, atol=3e-2, rtol=3e-2)

    print("KERNEL_OK")
</pallas_src>

<mosaic_0001>
module attributes {stable_mosaic.version = 11 : i64} {
  func.func @_patch_embed_kernel(%arg0: i32, %arg1: i32, %arg2: memref<128x32xbf16, #tpu.memory_space<vmem>>, %arg3: memref<32x128xbf16, #tpu.memory_space<vmem>>, %arg4: memref<1x128xf32, #tpu.memory_space<vmem>>, %arg5: memref<128x128xf32, #tpu.memory_space<vmem>>) attributes {dimension_semantics = [#tpu.dimension_semantics<parallel>, #tpu.dimension_semantics<arbitrary>], iteration_bounds = array<i64: 1, 1>, scalar_prefetch = 0 : i64, scratch_operands = 0 : i64, tpu.core_type = #tpu.core_type<tc>, window_params = [{transform_indices = @transform_0, window_bounds = array<i64: 128, 32>}, {transform_indices = @transform_1, window_bounds = array<i64: 32, 128>}, {pipeline_mode = #tpu.pipeline_mode<synchronous>, transform_indices = @transform_2, window_bounds = array<i64: 1, 128>}, {transform_indices = @transform_3, window_bounds = array<i64: 128, 128>}]} {
    %c0 = arith.constant 0 : index
    %c0_0 = arith.constant 0 : index
    %0 = vector.load %arg2[%c0, %c0_0] : memref<128x32xbf16, #tpu.memory_space<vmem>>, vector<128x32xbf16>
    %c0_1 = arith.constant 0 : index
    %c0_2 = arith.constant 0 : index
    %1 = vector.load %arg3[%c0_1, %c0_2] : memref<32x128xbf16, #tpu.memory_space<vmem>>, vector<32x128xbf16>
    %cst = arith.constant dense<0.000000e+00> : vector<128x128xf32>
    %2 = tpu.matmul %0, %1, %cst {dimension_numbers = #tpu.dot_dimension_numbers<[1], [0], [0], [1], [0, 0, 1, 1], [], []>} : vector<128x32xbf16>, vector<32x128xbf16>, vector<128x128xf32> -> vector<128x128xf32>
    %c0_3 = arith.constant 0 : index
    %c0_4 = arith.constant 0 : index
    %3 = vector.load %arg4[%c0_3, %c0_4] : memref<1x128xf32, #tpu.memory_space<vmem>>, vector<1x128xf32>
    %4 = vector.broadcast %3 : vector<1x128xf32> to vector<128x128xf32>
    %5 = arith.addf %2, %4 : vector<128x128xf32>
    %c0_5 = arith.constant 0 : index
    %c0_6 = arith.constant 0 : index
    %6 = vector.load %arg5[%c0_5, %c0_6] : memref<128x128xf32, #tpu.memory_space<vmem>>, vector<128x128xf32>
    tpu.vector_store %arg5[%c0_5, %c0_6], %5 {strides = array<i32>} : memref<128x128xf32, #tpu.memory_space<vmem>>, vector<128x128xf32>,
    return
  }
  func.func @transform_0(%arg0: i32, %arg1: i32) -> (i32, i32) {
    %c0_i32 = arith.constant 0 : i32
    return %arg0, %arg1 : i32, i32
  }
  func.func @transform_1(%arg0: i32, %arg1: i32) -> (i32, i32) {
    %c0_i32 = arith.constant 0 : i32
    %c0_i32_0 = arith.constant 0 : i32
    return %arg1, %c0_i32 : i32, i32
  }
  func.func @transform_2(%arg0: i32, %arg1: i32) -> (i32, i32) {
    %c0_i32 = arith.constant 0 : i32
    %c0_i32_0 = arith.constant 0 : i32
    %c0_i32_1 = arith.constant 0 : i32
    return %c0_i32, %c0_i32_0 : i32, i32
  }
  func.func @transform_3(%arg0: i32, %arg1: i32) -> (i32, i32) {
    %c0_i32 = arith.constant 0 : i32
    %c0_i32_0 = arith.constant 0 : i32
    return %arg0, %c0_i32 : i32, i32
  }
}

</mosaic_0001>

<bundles_post_ra>
// kernel: _lambda_.1
= control target key start
LH: loop header
LB: loop body
LE: loop exit
PB: predicated region body
PF: predicated region fallthrough
CT: control target
= control target key end

     0   :  { %s361_s0 = inlined_call_operand.vmem [shape: bf16[128,32], index: 0, kind: input, shape index: {}]   ;;  %s362_s1 = inlined_call_operand.vmem [shape: bf16[32,128], index: 1, kind: input, shape index: {}]   ;;  %s363_s2 = inlined_call_operand.vmem [shape: f32[1,128], index: 2, kind: input, shape index: {}]   ;;  %s364_s3 = inlined_call_operand.hbm [shape: f32[128,128], index: 3, kind: output, shape index: {}]  }
   0x1   :  { %v257_v0 = vld [vmem:[%s362_s1 + $0x8] sm:$0xff]  ;;  %v256_v1 = vld [vmem:[%s362_s1] sm:$0xff] }
   0x2   :  { %123 = vmatpush.bf16.msra.mxu0 %v257_v0  ;;  %258 = vmatpush.bf16.msra.mxu1 %v257_v0 }
   0x3   :  { %259 = vmatpush.bf16.msra.mxu2 %v257_v0  ;;  %260 = vmatpush.bf16.msra.mxu3 %v257_v0 }
   0x4   :  { %8 = vsyncpa [#allocation3], 0  ;;  %v248_v2 = vld [vmem:[%s361_s0] sm:$0xff]  ;;  %v250_v3 = vld [vmem:[%s361_s0 + $0x10] sm:$0xff]  ;;  %vm92_vm0 = vcmask 261120   ;;  %s188_s8 = sshll.u32 %s364_s3, 4  ;;  %s189_s8 = int_to_ptr.hbm [resolvable:$true] %s188_s8 }
   0x5   :  { %v252_v4 = vld [vmem:[%s361_s0 + $0x20] sm:$0xff]  ;;  %v254_v5 = vld [vmem:[%s361_s0 + $0x30] sm:$0xff]  ;;  %v249_v6 = vld [vmem:[%s361_s0 + $0x8] sm:$0xff]  ;;  %s295_s9 = smov 128   ;;  %s296_s10 = smov 8  }
   0x6   :  { %124 = vmatpush.bf16.msra.mxu0 %v256_v1  ;;  %261 = vmatpush.bf16.msra.mxu1 %v256_v1  ;;  %v251_v7 = vld [vmem:[%s361_s0 + $0x18] sm:$0xff]  ;;  %v253_v8 = vld [vmem:[%s361_s0 + $0x28] sm:$0xff]  ;;  %v267_v10 = vld [vmem:[%s363_s2] ss:$0 sm:$0xff] }
   0x7   :  { %262 = vmatpush.bf16.msra.mxu2 %v256_v1  ;;  %263 = vmatpush.bf16.msra.mxu3 %v256_v1  ;;  %v255_v9 = vld [vmem:[%s361_s0 + $0x38] sm:$0xff]  ;;  %s294_s0 = smov [#allocation2]  }
   0x8   :  { %s186_s2 = sshll.u32 %s294_s0, 4  ;;  %s187_s2 = int_to_ptr.vmem [resolvable:$true] %s186_s2 }
   0x9   :  { %240 = vmatmul.msk.bf16.vlgmr.msra.gmra.mxu0 %vm92_vm0, %v248_v2  ;;  %242 = vmatmul.msk.bf16.vlgmr.msra.gmra.mxu1 %vm92_vm0, %v250_v3 }
   0xa   :  { %244 = vmatmul.msk.bf16.vlgmr.msra.gmra.mxu2 %vm92_vm0, %v252_v4  ;;  %246 = vmatmul.msk.bf16.vlgmr.msra.gmra.mxu3 %vm92_vm0, %v254_v5 }
  0x19   :  { %241 = vmatmul.msk.bf16.gmra.mxu0 %vm92_vm0, %v249_v6  ;;  %243 = vmatmul.msk.bf16.gmra.mxu1 %vm92_vm0, %v251_v7 }
  0x1a   :  { %245 = vmatmul.msk.bf16.gmra.mxu2 %vm92_vm0, %v253_v8  ;;  %247 = vmatmul.msk.bf16.gmra.mxu3 %vm92_vm0, %v255_v9 }
  0x86   :  { %v126_v11 = vpop.f32.mrf.mxu0  ;;  %v136_v12 = vpop.f32.mrf.mxu1 }
  0x87   :  { %v127_v13 = vadd.f32 %v267_v10, %v126_v11  ;;  %v137_v14 = vadd.f32 %v267_v10, %v136_v12 }
  0x89   :  { %166 = vst [vmem:[#allocation2] sm:$0xff] %v127_v13 }
  0x8a   :  { %170 = vst [vmem:[#allocation2 + $0x20] sm:$0xff] %v137_v14 }
  0x8d   :  { %v146_v15 = vpop.f32.mrf.mxu2  ;;  %v156_v16 = vpop.f32.mrf.mxu3 }
  0x8e   :  { %v147_v17 = vadd.f32 %v267_v10, %v146_v15  ;;  %v157_v18 = vadd.f32 %v267_v10, %v156_v16  ;;  %v128_v19 = vpop.f32.mrf.mxu0  ;;  %v138_v20 = vpop.f32.mrf.mxu1 }
  0x8f   :  { %v129_v21 = vadd.f32 %v267_v10, %v128_v19  ;;  %v139_v22 = vadd.f32 %v267_v10, %v138_v20 }
  0x90   :  { %174 = vst [vmem:[#allocation2 + $0x40] sm:$0xff] %v147_v17 }
  0x91   :  { %178 = vst [vmem:[#allocation2 + $0x60] sm:$0xff] %v157_v18 }
  0x92   :  { %167 = vst [vmem:[#allocation2 + $0x8] sm:$0xff] %v129_v21 }
  0x93   :  { %171 = vst [vmem:[#allocation2 + $0x28] sm:$0xff] %v139_v22 }
  0x95   :  { %v148_v23 = vpop.f32.mrf.mxu2  ;;  %v158_v24 = vpop.f32.mrf.mxu3 }
  0x96   :  { %v149_v25 = vadd.f32 %v267_v10, %v148_v23  ;;  %v159_v26 = vadd.f32 %v267_v10, %v158_v24  ;;  %v131_v27 = vpop.f32.mrf.mxu0  ;;  %v141_v28 = vpop.f32.mrf.mxu1 }
  0x97   :  { %v132_v29 = vadd.f32 %v267_v10, %v131_v27  ;;  %v142_v30 = vadd.f32 %v267_v10, %v141_v28 }
  0x98   :  { %175 = vst [vmem:[#allocation2 + $0x48] sm:$0xff] %v149_v25 }
  0x99   :  { %179 = vst [vmem:[#allocation2 + $0x68] sm:$0xff] %v159_v26 }
  0x9a   :  { %168 = vst [vmem:[#allocation2 + $0x10] sm:$0xff] %v132_v29 }
  0x9b   :  { %172 = vst [vmem:[#allocation2 + $0x30] sm:$0xff] %v142_v30 }
  0x9d   :  { %v151_v31 = vpop.f32.mrf.mxu2  ;;  %v161_v32 = vpop.f32.mrf.mxu3 }
  0x9e   :  { %v152_v33 = vadd.f32 %v267_v10, %v151_v31  ;;  %v162_v34 = vadd.f32 %v267_v10, %v161_v32  ;;  %v133_v35 = vpop.f32.mrf.mxu0  ;;  %v143_v36 = vpop.f32.mrf.mxu1 }
  0x9f   :  { %v134_v37 = vadd.f32 %v267_v10, %v133_v35  ;;  %v144_v38 = vadd.f32 %v267_v10, %v143_v36 }
  0xa0   :  { %176 = vst [vmem:[#allocation2 + $0x50] sm:$0xff] %v152_v33 }
  0xa1   :  { %180 = vst [vmem:[#allocation2 + $0x70] sm:$0xff] %v162_v34 }
  0xa2   :  { %169 = vst [vmem:[#allocation2 + $0x18] sm:$0xff] %v134_v37 }
  0xa3   :  { %173 = vst [vmem:[#allocation2 + $0x38] sm:$0xff] %v144_v38 }
  0xa5   :  { %v153_v39 = vpop.f32.mrf.mxu2  ;;  %v163_v40 = vpop.f32.mrf.mxu3 }
  0xa6   :  { %v154_v41 = vadd.f32 %v267_v10, %v153_v39  ;;  %v164_v42 = vadd.f32 %v267_v10, %v163_v40 }
  0xa8   :  { %177 = vst [vmem:[#allocation2 + $0x58] sm:$0xff] %v154_v41 }
  0xa9   :  { %181 = vst [vmem:[#allocation2 + $0x78] sm:$0xff] %v164_v42 }
  0xaa   :  { %194 = dma.vmem_to_hbm [thread:$0]  %s187_s2, 2048, %s189_s8, [#allocation3], %s295_s9, %s295_s9, %s296_s10  }
  0xab   :  { %292 = dma.done.wait [#allocation3], 2048  }
  0xac   :  { %293 = vsyncadd [#allocation3], 4294965248 }
  0xad   :  { %199 = vsyncpa [#allocation3], 1 }

</bundles_post_ra>
